<compile_context>
chip_gen: v7x
topology: tpu7x:2x2x1
jax: 0.10.0
libtpu: 0.0.40
codegen_flags: <defaults>
</compile_context>

<pallas_src>
import jax
import jax.numpy as jnp
import numpy as np
from jax import lax
from jax.experimental import pallas as pl
from jax.experimental.pallas import tpu as pltpu

EPS = 1e-5
LANE = 128            # lane width: Cout / K padded to multiples of this


def _round_up(x, m):
    return (x + m - 1) // m * m


def _pad_to(a, shape):
    pads = [(0, t - s) for s, t in zip(a.shape, shape)]
    if any(hi for _, hi in pads):
        a = jnp.pad(a, pads)
    return a


# ----------------------------- Pallas kernels ------------------------------ #

def _conv_bn_relu_kernel(p_ref, w_ref, s_ref, b_ref, o_ref):
    """One (TM, K) patch tile: relu((p @ w) * scale + shift); bf16 in, f32 acc."""
    y = jnp.dot(p_ref[0], w_ref[...], preferred_element_type=jnp.float32)
    y = y * s_ref[...] + b_ref[...]
    o_ref[0] = jnp.maximum(y, 0.0).astype(o_ref.dtype)


def _make_conv2_fused_kernel(th, wo, cp, down):
    """conv2(3x3,s=1,p=1) + bn2 + shortcut (+1x1 conv + bn if `down`) + add + relu.

    The 3x3 patches are built inside the kernel from a VMEM-resident padded
    activation image (halo window of th+2 rows per M tile)."""
    m = th * wo

    def compute(y_ref, w2_ref, s2_ref, b2_ref, r_ref, wd_ref, sd_ref, bd_ref, o_ref):
        mt = pl.program_id(1)
        row0 = mt * th                         # top row of this tile in padded image
        # (th+2, Wp, Cp) halo window; slices/concat in f32 (safest layout path).
        win = y_ref[0, pl.ds(row0, th + 2), :, :].astype(jnp.float32)
        taps = [win[kh:kh + th, kw:kw + wo, :]
                for kh in range(3) for kw in range(3)]
        patches = jnp.concatenate(taps, axis=-1).reshape(m, 9 * cp)
        patches = patches.astype(jnp.bfloat16)                    # MXU operand
        y = jnp.dot(patches, w2_ref[...], preferred_element_type=jnp.float32)
        y = y * s2_ref[...] + b2_ref[...]
        if down:
            r = jnp.dot(r_ref[0], wd_ref[...], preferred_element_type=jnp.float32)
            r = r * sd_ref[...] + bd_ref[...]
        else:
            r = r_ref[0].astype(jnp.float32)
        o_ref[0] = jnp.maximum(y + r, 0.0).astype(o_ref.dtype)

    if down:
        def kernel(y_ref, w2_ref, s2_ref, b2_ref, r_ref, wd_ref, sd_ref, bd_ref, o_ref):
            compute(y_ref, w2_ref, s2_ref, b2_ref, r_ref, wd_ref, sd_ref, bd_ref, o_ref)
    else:
        def kernel(y_ref, w2_ref, s2_ref, b2_ref, r_ref, o_ref):
            compute(y_ref, w2_ref, s2_ref, b2_ref, r_ref, None, None, None, o_ref)
    return kernel


# ------------------------------ pallas_call wrappers ----------------------- #

def _conv1_call(patches, w, scale, shift, tm):
    N, Mp, Kp = patches.shape
    Cp = w.shape[1]
    flops = 2 * N * Mp * Kp * Cp
    bytes_acc = (patches.size * 2 + w.size * 2 + (scale.size + shift.size) * 4
                 + N * Mp * Cp * 2)
    return pl.pallas_call(
        _conv_bn_relu_kernel,
        out_shape=jax.ShapeDtypeStruct((N, Mp, Cp), jnp.bfloat16),
        grid=(N, Mp // tm),
        in_specs=[
            pl.BlockSpec((1, tm, Kp), lambda n, m: (n, m, 0)),
            pl.BlockSpec((Kp, Cp), lambda n, m: (0, 0)),    # VMEM-resident
            pl.BlockSpec((1, Cp), lambda n, m: (0, 0)),
            pl.BlockSpec((1, Cp), lambda n, m: (0, 0)),
        ],
        out_specs=pl.BlockSpec((1, tm, Cp), lambda n, m: (n, m, 0)),
        compiler_params=pltpu.CompilerParams(
            dimension_semantics=("parallel", "parallel")),
        cost_estimate=pl.CostEstimate(flops=int(flops), transcendentals=0,
                                      bytes_accessed=int(bytes_acc)),
    )(patches, w, scale, shift)


def _conv2_fused_call(y_pad, w2, s2, b2, res, down_params, th, wo, cp):
    N, Hp, Wp, _ = y_pad.shape
    Ho = Hp - 2
    M = Ho * wo
    tm = th * wo
    down = down_params is not None
    kernel = _make_conv2_fused_kernel(th, wo, cp, down)

    in_specs = [
        # whole padded activation image, resident per batch element
        pl.BlockSpec((1, Hp, Wp, cp), lambda n, m: (n, 0, 0, 0)),
        pl.BlockSpec((9 * cp, cp), lambda n, m: (0, 0)),
        pl.BlockSpec((1, cp), lambda n, m: (0, 0)),
        pl.BlockSpec((1, cp), lambda n, m: (0, 0)),
        pl.BlockSpec((1, tm, res.shape[-1]), lambda n, m: (n, m, 0)),
    ]
    args = [y_pad, w2, s2, b2, res]
    flops = 2 * N * M * (9 * cp) * cp
    bytes_acc = (y_pad.size * 2 + w2.size * 2 + (s2.size + b2.size) * 4
                 + res.size * 2 + N * M * cp * 4)
    if down:
        wd, sd, bd = down_params
        in_specs += [
            pl.BlockSpec((res.shape[-1], cp), lambda n, m: (0, 0)),
            pl.BlockSpec((1, cp), lambda n, m: (0, 0)),
            pl.BlockSpec((1, cp), lambda n, m: (0, 0)),
        ]
        args += [wd, sd, bd]
        flops += 2 * N * M * res.shape[-1] * cp
        bytes_acc += wd.size * 2 + (sd.size + bd.size) * 4

    return pl.pallas_call(
        kernel,
        out_shape=jax.ShapeDtypeStruct((N, M, cp), jnp.float32),
        grid=(N, Ho // th),
        in_specs=in_specs,
        out_specs=pl.BlockSpec((1, tm, cp), lambda n, m: (n, m, 0)),
        compiler_params=pltpu.CompilerParams(
            dimension_semantics=("parallel", "parallel")),
        cost_estimate=pl.CostEstimate(flops=int(flops), transcendentals=0,
                                      bytes_accessed=int(bytes_acc)),
    )(*args)


# ------------------------------- glue (plain JAX) --------------------------- #

def _im2col_3x3(x_nhwc, stride):
    """Extract 3x3 patches (padding=1) -> (N, Ho*Wo, 9*C)."""
    N, H, W, C = x_nhwc.shape
    xp = jnp.pad(x_nhwc, ((0, 0), (1, 1), (1, 1), (0, 0)))
    Ho = (H + 2 - 3) // stride + 1
    Wo = (W + 2 - 3) // stride + 1
    cols = []
    for kh in range(3):
        for kw in range(3):
            cols.append(xp[:, kh:kh + stride * (Ho - 1) + 1:stride,
                           kw:kw + stride * (Wo - 1) + 1:stride, :])
    patches = jnp.concatenate(cols, axis=-1)                  # (N, Ho, Wo, 9C)
    return patches.reshape(N, Ho * Wo, 9 * C), Ho, Wo


def _fold_bn(gamma, beta, mean, var):
    scale = gamma / jnp.sqrt(var + EPS)
    shift = beta - mean * scale
    return scale[None, :].astype(jnp.float32), shift[None, :].astype(jnp.float32)


def init_basic_block(key, in_channels, out_channels, is_downsample):
    """Deterministic synthetic parameters mirroring BasicBlock.__init__."""
    stride = 2 if is_downsample else 1
    has_down = is_downsample or (in_channels != out_channels)
    ks = jax.random.split(key, 6)

    def bn_params(k):
        k1, k2, k3, k4 = jax.random.split(k, 4)
        return dict(
            gamma=jax.random.uniform(k1, (out_channels,), minval=0.8, maxval=1.2),
            beta=0.1 * jax.random.normal(k2, (out_channels,)),
            mean=0.1 * jax.random.normal(k3, (out_channels,)),
            var=jax.random.uniform(k4, (out_channels,), minval=0.5, maxval=1.5),
        )

    params = dict(
        conv1_w=0.1 * jax.random.normal(ks[0], (out_channels, in_channels, 3, 3)),
        bn1=bn_params(ks[1]),
        conv2_w=0.1 * jax.random.normal(ks[2], (out_channels, out_channels, 3, 3)),
        bn2=bn_params(ks[3]),
    )
    if has_down:
        params["down_w"] = 0.1 * jax.random.normal(ks[4], (out_channels, in_channels, 1, 1))
        params["down_bn"] = bn_params(ks[5])
    return params, stride, has_down


def basic_block_forward(x_nchw, params, stride, has_down, *,
                        tm_conv1=128, conv2_tile_rows=128):
    """Forward pass.  tm_conv1 / conv2_tile_rows are per-generation tuning knobs:
    sweep up (512-2048 rows) on v5e/v6e's 128 MiB VMEM; keep modest on v7x's
    64 MiB (set pltpu.CompilerParams(vmem_limit_bytes=...) if going bigger)."""
    x = jnp.transpose(x_nchw, (0, 2, 3, 1))                        # NCHW -> NHWC
    N, H, W, Cin = x.shape
    Cout = params["conv1_w"].shape[0]
    Cp = _round_up(Cout, LANE)                                     # lane-dense channels
    Crp = _round_up(Cin, LANE)
    xb = x.astype(jnp.bfloat16)

    # --- conv1 (3x3, stride, pad=1) + bn1 + relu ---------------------------
    p1, Ho, Wo = _im2col_3x3(xb, stride)                           # (N, M1, 9*Cin) bf16
    M1 = Ho * Wo
    Kp1 = _round_up(9 * Cin, LANE)
    tm1 = min(tm_conv1, _round_up(M1, LANE))
    Mp1 = _round_up(M1, tm1)
    p1 = _pad_to(p1, (N, Mp1, Kp1))

    w1 = jnp.transpose(params["conv1_w"], (2, 3, 1, 0)).reshape(9 * Cin, Cout)
    w1 = _pad_to(w1, (Kp1, Cp)).astype(jnp.bfloat16)
    s1, b1 = _fold_bn(**params["bn1"])
    s1, b1 = _pad_to(s1, (1, Cp)), _pad_to(b1, (1, Cp))

    y1 = _conv1_call(p1, w1, s1, b1, tm1)                          # (N, Mp1, Cp) bf16
    y_img = y1[:, :M1, :].reshape(N, Ho, Wo, Cp)
    Wp = _round_up(Wo + 2, 8)                                      # layout-friendly sublanes
    y_pad = jnp.pad(y_img, ((0, 0), (1, 1), (1, Wp - Wo - 1), (0, 0)))

    # --- conv2 (3x3, s=1, p=1) + bn2  (+) shortcut  (+) relu  -- one fused kernel
    w2 = jnp.transpose(params["conv2_w"], (2, 3, 1, 0))            # (3,3,Cout,Cout)
    w2p = jnp.zeros((3, 3, Cp, Cp), jnp.float32).at[:, :, :Cout, :Cout].set(w2)
    w2p = w2p.reshape(9 * Cp, Cp).astype(jnp.bfloat16)
    s2, b2 = _fold_bn(**params["bn2"])
    s2, b2 = _pad_to(s2, (1, Cp)), _pad_to(b2, (1, Cp))

    if has_down:
        xr = xb[:, ::stride, ::stride, :].reshape(N, M1, Cin)      # 1x1 stride-s sampling
        res = _pad_to(xr, (N, M1, Crp))
        wd = jnp.transpose(params["down_w"], (2, 3, 1, 0)).reshape(Cin, Cout)
        wd = _pad_to(wd, (Crp, Cp)).astype(jnp.bfloat16)
        sd, bd = _fold_bn(**params["down_bn"])
        down_params = (wd, _pad_to(sd, (1, Cp)), _pad_to(bd, (1, Cp)))
    else:
        res = _pad_to(xb.reshape(N, M1, Cin), (N, M1, Cp))         # Cin == Cout here
        down_params = None

    # output-row tile: th divides Ho, th*Wo ~ conv2_tile_rows
    th = Ho
    while th * Wo > conv2_tile_rows and th % 2 == 0:
        th //= 2

    out = _conv2_fused_call(y_pad, w2p, s2, b2, res, down_params, th, Wo, Cp)
    out = out[:, :, :Cout].reshape(N, Ho, Wo, Cout)
    return jnp.transpose(out, (0, 3, 1, 2))                        # back to NCHW


# ------------------------------- pure-JAX reference ------------------------- #

def reference_forward(x, params, stride, has_down):
    def conv(v, w, s, pad):
        return lax.conv_general_dilated(
            v, w, (s, s), ((pad, pad), (pad, pad)),
            dimension_numbers=("NCHW", "OIHW", "NCHW"))

    def bn(v, p):
        return ((v - p["mean"][None, :, None, None])
                / jnp.sqrt(p["var"][None, :, None, None] + EPS)
                * p["gamma"][None, :, None, None] + p["beta"][None, :, None, None])

    y = jax.nn.relu(bn(conv(x, params["conv1_w"], stride, 1), params["bn1"]))
    y = bn(conv(y, params["conv2_w"], 1, 1), params["bn2"])
    if has_down:
        x = bn(conv(x, params["down_w"], stride, 0), params["down_bn"])
    return jax.nn.relu(x + y)


# ------------------------------------ main ---------------------------------- #

if __name__ == "__main__":
    root = jax.random.PRNGKey(0)
    configs = [
        (4, 8, True),    # downsample: conv1 stride 2 + 1x1 stride-2 shortcut
        (4, 8, False),   # channel change: 1x1 stride-1 shortcut
        (8, 8, False),   # identity shortcut
    ]
    for idx, (cin, cout, ds) in enumerate(configs):
        kp, kx = jax.random.split(jax.random.fold_in(root, idx))
        params, stride, has_down = init_basic_block(kp, cin, cout, ds)
        x = jax.random.normal(kx, (2, cin, 16, 16), jnp.float32)

        out = jax.block_until_ready(basic_block_forward(x, params, stride, has_down))
        ref = jax.block_until_ready(reference_forward(x, params, stride, has_down))

        assert out.shape == ref.shape, (out.shape, ref.shape)
        # bf16 MXU operands (f32 accumulation) -> slightly looser tolerance than f32.
        np.testing.assert_allclose(np.asarray(out), np.asarray(ref),
                                   rtol=3e-2, atol=3e-2)
    print("KERNEL_OK")
</pallas_src>

<mosaic_0001>
module attributes {stable_mosaic.version = 11 : i64} {
  func.func @_conv_bn_relu_kernel(%arg0: i32, %arg1: i32, %arg2: memref<1x128x128xbf16, #tpu.memory_space<vmem>>, %arg3: memref<128x128xbf16, #tpu.memory_space<vmem>>, %arg4: memref<1x128xf32, #tpu.memory_space<vmem>>, %arg5: memref<1x128xf32, #tpu.memory_space<vmem>>, %arg6: memref<1x128x128xbf16, #tpu.memory_space<vmem>>) attributes {dimension_semantics = [#tpu.dimension_semantics<parallel>, #tpu.dimension_semantics<parallel>], iteration_bounds = array<i64: 2, 1>, scalar_prefetch = 0 : i64, scratch_operands = 0 : i64, tpu.core_type = #tpu.core_type<tc>, window_params = [{transform_indices = @transform_0, window_bounds = array<i64: 1, 128, 128>}, {pipeline_mode = #tpu.pipeline_mode<synchronous>, transform_indices = @transform_1, window_bounds = array<i64: 128, 128>}, {pipeline_mode = #tpu.pipeline_mode<synchronous>, transform_indices = @transform_2, window_bounds = array<i64: 1, 128>}, {pipeline_mode = #tpu.pipeline_mode<synchronous>, transform_indices = @transform_3, window_bounds = array<i64: 1, 128>}, {transform_indices = @transform_4, window_bounds = array<i64: 1, 128, 128>}]} {
    %c0 = arith.constant 0 : index
    %c0_0 = arith.constant 0 : index
    %c0_1 = arith.constant 0 : index
    %0 = vector.load %arg2[%c0, %c0_0, %c0_1] : memref<1x128x128xbf16, #tpu.memory_space<vmem>>, vector<1x128x128xbf16>
    %1 = vector.shape_cast %0 : vector<1x128x128xbf16> to vector<128x128xbf16>
    %c0_2 = arith.constant 0 : index
    %c0_3 = arith.constant 0 : index
    %2 = vector.load %arg3[%c0_2, %c0_3] : memref<128x128xbf16, #tpu.memory_space<vmem>>, vector<128x128xbf16>
    %cst = arith.constant dense<0.000000e+00> : vector<128x128xf32>
    %3 = tpu.matmul %1, %2, %cst {dimension_numbers = #tpu.dot_dimension_numbers<[1], [0], [0], [1], [0, 0, 1, 1], [], []>} : vector<128x128xbf16>, vector<128x128xbf16>, vector<128x128xf32> -> vector<128x128xf32>
    %c0_4 = arith.constant 0 : index
    %c0_5 = arith.constant 0 : index
    %4 = vector.load %arg4[%c0_4, %c0_5] : memref<1x128xf32, #tpu.memory_space<vmem>>, vector<1x128xf32>
    %5 = vector.broadcast %4 : vector<1x128xf32> to vector<128x128xf32>
    %6 = arith.mulf %3, %5 : vector<128x128xf32>
    %c0_6 = arith.constant 0 : index
    %c0_7 = arith.constant 0 : index
    %7 = vector.load %arg5[%c0_6, %c0_7] : memref<1x128xf32, #tpu.memory_space<vmem>>, vector<1x128xf32>
    %8 = vector.broadcast %7 : vector<1x128xf32> to vector<128x128xf32>
    %9 = arith.addf %6, %8 : vector<128x128xf32>
    %cst_8 = arith.constant 0.000000e+00 : f32
    %10 = vector.broadcast %cst_8 : f32 to vector<128x128xf32>
    %11 = arith.maximumf %9, %10 : vector<128x128xf32>
    %12 = arith.truncf %11 : vector<128x128xf32> to vector<128x128xbf16>
    %c0_9 = arith.constant 0 : index
    %c0_10 = arith.constant 0 : index
    %c0_11 = arith.constant 0 : index
    %13 = vector.load %arg6[%c0_9, %c0_10, %c0_11] : memref<1x128x128xbf16, #tpu.memory_space<vmem>>, vector<1x128x128xbf16>
    %14 = vector.shape_cast %13 : vector<1x128x128xbf16> to vector<128x128xbf16>
    %15 = vector.shape_cast %12 : vector<128x128xbf16> to vector<1x128x128xbf16>
    tpu.vector_store %arg6[%c0_9, %c0_10, %c0_11], %15 {strides = array<i32>} : memref<1x128x128xbf16, #tpu.memory_space<vmem>>, vector<1x128x128xbf16>,
    return
  }
  func.func @transform_0(%arg0: i32, %arg1: i32) -> (i32, i32, i32) {
    %c0_i32 = arith.constant 0 : i32
    %c0_i32_0 = arith.constant 0 : i32
    return %arg0, %arg1, %c0_i32 : i32, i32, i32
  }
  func.func @transform_1(%arg0: i32, %arg1: i32) -> (i32, i32) {
    %c0_i32 = arith.constant 0 : i32
    %c0_i32_0 = arith.constant 0 : i32
    %c0_i32_1 = arith.constant 0 : i32
    return %c0_i32, %c0_i32_0 : i32, i32
  }
  func.func @transform_2(%arg0: i32, %arg1: i32) -> (i32, i32) {
    %c0_i32 = arith.constant 0 : i32
    %c0_i32_0 = arith.constant 0 : i32
    %c0_i32_1 = arith.constant 0 : i32
    return %c0_i32, %c0_i32_0 : i32, i32
  }
  func.func @transform_3(%arg0: i32, %arg1: i32) -> (i32, i32) {
    %c0_i32 = arith.constant 0 : i32
    %c0_i32_0 = arith.constant 0 : i32
    %c0_i32_1 = arith.constant 0 : i32
    return %c0_i32, %c0_i32_0 : i32, i32
  }
  func.func @transform_4(%arg0: i32, %arg1: i32) -> (i32, i32, i32) {
    %c0_i32 = arith.constant 0 : i32
    %c0_i32_0 = arith.constant 0 : i32
    return %arg0, %arg1, %c0_i32 : i32, i32, i32
  }
}

</mosaic_0001>

<bundles_post_ra>
// kernel: tpu_custom_call.1
= control target key start
LH: loop header
LB: loop body
LE: loop exit
PB: predicated region body
PF: predicated region fallthrough
CT: control target
= control target key end

     0   :  { %9 = vsyncpa [#allocation3], 0  ;;  %s1457_s0 = inlined_call_operand.hbm [shape: bf16[2,128,128], index: 0, kind: input, shape index: {}]   ;;  %s1458_s1 = inlined_call_operand.hbm [shape: bf16[128,128], index: 1, kind: input, shape index: {}]   ;;  %s1459_s2 = inlined_call_operand.vmem [shape: f32[1,128], index: 2, kind: input, shape index: {}]   ;;  %s1460_s3 = inlined_call_operand.vmem [shape: f32[1,128], index: 3, kind: input, shape index: {}]   ;;  %s1461_s4 = inlined_call_operand.hbm [shape: bf16[2,128,128], index: 4, kind: output, shape index: {}]  }
   0x1   :  { %11 = vsyncpa [#allocation3 + $0x1], 0 }
   0x2   :  { %12 = vsyncpa [#allocation6], 0 }
   0x3   :  { %13 = vsyncpa [#allocation4], 0 }
   0x4   :  { %15 = vsyncpa [#allocation4 + $0x1], 0  ;;  %s1183_s15 = smov 0   ;;  %s1185_s16 = smov 0  }
   0x5   :  { %s1187_s17 = smov 0   ;;  %s1189_s18 = smov 0  }
   0x6   :  { %s1191_s19 = smov 0   ;;  %s1193_s20 = smov 0  }
   0x7 LB: > { %s732_s21 = sadd.s32 4294967295, %s1149_s20   ;;  %s733_s22 = sadd.s32 4294967294, %s1149_s20   ;;  %s1149_s20 = sphi %s1193_s20, %s21_s20   ;;  %s1145_s19 = sphi %s1191_s19, %s1485_s19   ;;  %s1141_s18 = sphi %s1189_s18, %s1484_s18   ;;  %s1137_s17 = sphi %s1187_s17, %s1483_s17   ;;  %s1133_s16 = sphi %s1185_s16, %s1482_s16   ;;  %s1129_s15 = sphi %s1183_s15, %s1481_s15  }
   0x8   : > { %p55_p0 = scmp.ne.s32.totalorder %s1133_s16, %s1129_s15  ;;  %p1217_p1 = scmp.eq.s32.totalorder %s732_s21, 0 }
   0x9   : > { %p1221_p2 = scmp.eq.s32.totalorder %s732_s21, 1  ;;  %p150_p3 = scmp.eq.s32.totalorder %s733_s22, 1 }
   0xa   : > { %s1466_s23 = scalar_select %p1217_p1, 1, 0 }
   0xb   : > { %s1467_s24 = scalar_select %p1221_p2, 1, 0 }
   0xc   : > { %p1227_p4 = por %p1217_p1, %p55_p0  ;;  %p734_p5 = scmp.ge.s32.totalorder %s1149_s20, 1 }
   0xd   : > { %p1232_p6 = por %p150_p3, %p55_p0  ;;  %p157_p7 = scmp.lt.s32.totalorder %s1149_s20, 3 }
   0xe   : > { %s1468_s25 = scalar_select %p1227_p4, 1, 0 }
   0xf   : > { %s1469_s26 = scalar_select %p1232_p6, 1, 0 }
  0x10   : > { %p1237_p8 = pnand %p734_p5, %p157_p7  ;;  %s1151_s28 = smov [#allocation5]  }
  0x11   : > { %s169_s29 = sshll.u32 %s1151_s28, 4  ;;  %s33_s5 = sadd.s32 1, %s1145_s19  ;;  %s170_s29 = int_to_ptr.vmem [resolvable:$true] %s169_s29 }
  0x12   : > { %s1470_s27 = scalar_select %p1237_p8, 1, 0 }
  0x13   : > { %p920_p9 = pneg %p1237_p8  ;;  %s1005_s8 = scalar_lea.hbm %s1458_s1, 1024 }
  0x14   : > { %p1006_p12 = scmp.ne.s32.totalorder %s1458_s1, %s1005_s8  ;;  %p1012_p5 = scmp.lt.u32.totalorder %s1005_s8, %s1458_s1 }
  0x15   : > { %p1246_p11 = pnand %p920_p9, %p1217_p1 }
  0x17   : > { %p1007_p13 = pneg %p1246_p11 }
  0x19   : > { %p1008_p0 = pnand %p1007_p13, %p1006_p12 }
  0x1b   : > { %p1009_p3 = pneg %p1008_p0 }
  0x1d   : > { %p1014_p7 = pnand %p1012_p5, %p1009_p3 }
  0x1f   : > { %1017 = shalt.err (!%p1014_p7)
}
  0x20   : > { %s1018_s13 = scalar_lea.vmem %s170_s29, 1024  ;;  %p1026_p1 = scmp.lt.s32.totalorder %s170_s29, %s170_s29 }
  0x21   : > { %p1019_p9 = scmp.ne.s32.totalorder %s170_s29, %s1018_s13  ;;  %p1027_p4 = scmp.lt.s32.totalorder %s1018_s13, %s1018_s13 }
  0x23   : > { %p1021_p10 = pnand %p1019_p9, %p1007_p13  ;;  %p1028_p8 = por %p1027_p4, %p1026_p1 }
  0x25   : > { %p1022_p6 = pneg %p1021_p10 }
  0x27   : > { %p1029_p2 = pnand %p1028_p8, %p1022_p6 }
  0x29   : > { %1032 = shalt.err (!%p1029_p2)
}
  0x2a   : > { %s1152_s14 = smov 64   ;;  %s1153_s21 = smov 4  }
  0x2b   : > { %923 = dma.hbm_to_vmem [thread:$0]  (!%p1246_p11), %s1458_s1, 1024, %s170_s29, [#allocation6], %s1152_s14, %s1152_s14, %s1153_s21  }
  0x2c   : > { %p35_p1 = scmp.ge.s32.totalorder %s33_s5, 2  ;;  %s42_s6 = sadd.s32 1, %s1137_s17 }
  0x2d   : > { %p49_p2 = scmp.ne.s32.totalorder %s1137_s17, %s1133_s16  ;;  %p50_p4 = scmp.eq.s32.totalorder %s1149_s20, 0 }
  0x2e   : > { %s1487_s5 = smov (%p35_p1, %s33_s5), 0  ;;  %p1473_p8 = scmp.ne.s32.totalorder %s1467_s24, 0 }
  0x2f   : > { %p1276_p6 = por %p50_p4, %p49_p2  ;;  %s37_s8 = ssub.s32 %s1145_s19, %s1487_s5 }
  0x30   : > { %p1282_p10 = por %p1473_p8, %p49_p2  ;;  %p933_p12 = scmp.lt.s32.totalorder %s1149_s20, 2 }
  0x31   : > { %p40_p11 = scmp.eq.s32.totalorder %s37_s8, 0  ;;  %s189_s29 = sand.u32 1, %s1137_s17  }
  0x32   : > { %s737_s9 = sshll.u32 %s189_s29, 6  ;;  %s783_s11 = sshll.u32 %s1145_s19, 10 }
  0x33   : > { %s1291_s10 = scalar_select %p40_p11, %s1137_s17, %s42_s6  }
  0x34   : > { %s1297_s22 = scalar_lea.hbm %s1457_s0, %s783_s11  ;;  %s193_s24 = scalar_lea.vmem [#allocation2], %s737_s9 }
  0x35   : > { %s202_s28 = sshll.u32 %s193_s24, 4  ;;  %p1303_p13 = pnand %p933_p12, %p1276_p6  ;;  %s1299_s28 = int_to_ptr.vmem [resolvable:$true] %s202_s28 }
  0x36   : > { %s1307_s6 = scalar_lea.sflag [#allocation3], %s189_s29  ;;  %s1033_s12 = scalar_lea.hbm %s1297_s22, 1024 }
  0x37   : > { %p1034_p0 = scmp.ne.s32.totalorder %s1297_s22, %s1033_s12  ;;  %p1035_p3 = pneg %p1303_p13 }
  0x38   : > { %s1038_s7 = scalar_lea.hbm %s1457_s0, 2048  ;;  %p1039_p9 = scmp.lt.u32.totalorder %s1297_s22, %s1457_s0 }
  0x39   : > { %p1036_p5 = pnand %p1035_p3, %p1034_p0  ;;  %p1040_p1 = scmp.lt.u32.totalorder %s1038_s7, %s1033_s12 }
  0x3a   : > { %p1042_p4 = scmp.lt.u32.totalorder %s1033_s12, %s1297_s22 }
  0x3b   : > { %p1037_p7 = pneg %p1036_p5  ;;  %p1041_p2 = por %p1040_p1, %p1039_p9 }
  0x3d   : > { %p1043_p6 = por %p1042_p4, %p1041_p2 }
  0x3f   : > { %p1044_p8 = pnand %p1043_p6, %p1037_p7 }
  0x41   : > { %1047 = shalt.err (!%p1044_p8)
}
  0x42   : > { %s1048_s29 = scalar_lea.vmem %s1299_s28, 1024  ;;  %s1154_s9 = smov [#allocation2]  }
  0x43   : > { %p1049_p12 = scmp.ne.s32.totalorder %s1299_s28, %s1048_s29  ;;  %s1053_s11 = sshll.u32 %s1154_s9, 4  ;;  %s1054_s11 = int_to_ptr.vmem [resolvable:$false] %s1053_s11 }
  0x44   : > { %s1055_s13 = scalar_lea.vmem %s1054_s11, 2048  ;;  %p1056_p5 = scmp.lt.s32.totalorder %s1299_s28, %s1054_s11 }
  0x45   : > { %p1051_p11 = pnand %p1049_p12, %p1035_p3  ;;  %p1057_p9 = scmp.lt.s32.totalorder %s1055_s13, %s1048_s29 }
  0x47   : > { %p1052_p0 = pneg %p1051_p11  ;;  %p1058_p1 = por %p1057_p9, %p1056_p5 }
  0x49   : > { %p1059_p2 = pnand %p1058_p1, %p1052_p0 }
  0x4b   : > { %1062 = shalt.err (!%p1059_p2)
}
  0x4c   : > { %927 = dma.hbm_to_vmem [thread:$0]  (!%p1303_p13), %s1297_s22, 1024, %s1299_s28, %s1307_s6, %s1152_s14, %s1152_s14, %s1153_s21  }
  0x4d   : > { %p1476_p3 = scmp.ne.s32.totalorder %s1470_s27, 0 }
  0x4e   : > { %s1341_s12 = sand.u32 (!%p1476_p3), 1, %s1133_s16   ;;  %p1477_p7 = scmp.ne.s32.totalorder (!%p1476_p3), %s1468_s25, 0 }
  0x4f   : > { %214 = sbr.rel (%p1476_p3) target bundleno = 370 (0x172), region = 36  ;;  %s741_s7 = sshll.u32 (!%p1476_p3), %s1341_s12, 6 }
  0x50   : > { %s217_s24 = scalar_lea.sflag (!%p1476_p3), [#allocation3], %s1341_s12  ;;  %s1347_s8 = scalar_lea.vmem (!%p1476_p3), [#allocation2], %s741_s7 }
  0x56   : > { %1116 = dma.done.wait (%p1477_p7), %s217_s24, 1024  }
  0x57   : > { %1118 = vsyncadd (%p1477_p7), %s217_s24, 4294966272  ;;  %p1478_p13 = scmp.ne.s32.totalorder %s1466_s23, 0 }
  0x59   : > { %1120 = dma.done.wait (%p1478_p13), [#allocation6], 1024  }
  0x5a   : > { %1122 = vsyncadd (%p1478_p13), [#allocation6], 4294966272  ;;  %v989_v0 = vld [vmem:[#allocation5] sm:$0xff]   ;;  %v990_v1 = vld [vmem:[#allocation5 + $0x8] sm:$0xff]   ;;  %s1383_s21 = scalar_lea.vmem [#allocation7], %s741_s7  ;;  %s800_s22 = sshll.u32 %s1141_s18, 10 }
  0x5b   : > { %864 = vmatprep.subr.bf16.mxu0 %v989_v0  ;;  %896 = vmatprep.subr.bf16.mxu1 %v989_v0  ;;  %v991_v2 = vld [vmem:[#allocation5 + $0x10] sm:$0xff]   ;;  %v992_v3 = vld [vmem:[#allocation5 + $0x18] sm:$0xff]   ;;  %v997_v4 = vld [vmem:[%s1347_s8] sm:$0xff]   ;;  %s635_s28 = sshll.u32 %s1383_s21, 4  ;;  %s1402_s18 = scalar_lea.hbm %s1461_s4, %s800_s22  ;;  %s1404_s28 = int_to_ptr.vmem [resolvable:$true] %s635_s28 }
  0x5c   : > { %865 = vmatpush3.bf16.msra.mxu0 %v989_v0  ;;  %904 = vmatpush3.bf16.msra.mxu1 %v989_v0  ;;  %v998_v5 = vld [vmem:[%s1347_s8 + $0x20] sm:$0xff]   ;;  %v994_v7 = vld [vmem:[#allocation5 + $0x28] sm:$0xff]   ;;  %v995_v8 = vld [vmem:[#allocation5 + $0x30] sm:$0xff]   ;;  %s620_s9 = scalar_lea.sflag [#allocation4], %s1341_s12  ;;  %s1063_s11 = scalar_lea.vmem %s1404_s28, 1024 }
  0x5d   : > { %866 = vmatprep.subr.bf16.mxu0 %v990_v1  ;;  %897 = vmatprep.subr.bf16.mxu1 %v990_v1  ;;  %v993_v6 = vld [vmem:[#allocation5 + $0x20] sm:$0xff]   ;;  %v996_v9 = vld [vmem:[#allocation5 + $0x38] sm:$0xff]   ;;  %v999_v10 = vld [vmem:[%s1347_s8 + $0x8] sm:$0xff]   ;;  %p1064_p4 = scmp.ne.s32.totalorder %s1404_s28, %s1063_s11  ;;  %s1155_s13 = smov [#allocation7]  }
  0x5e   : > { %880 = vmatprep.mubr.bf16.mxu0 %v997_v4  ;;  %888 = vmatprep.mubr.bf16.mxu1 %v998_v5  ;;  %v1000_v11 = vld [vmem:[%s1347_s8 + $0x28] sm:$0xff]   ;;  %v1001_v12 = vld [vmem:[%s1347_s8 + $0x10] sm:$0xff]   ;;  %v1003_v14 = vld [vmem:[%s1347_s8 + $0x18] sm:$0xff]   ;;  %s1067_s7 = sshll.u32 %s1155_s13, 4  ;;  %s1068_s7 = int_to_ptr.vmem [resolvable:$false] %s1067_s7 }
  0x5f   : > { %v1002_v13 = vld [vmem:[%s1347_s8 + $0x30] sm:$0xff]   ;;  %v1004_v15 = vld [vmem:[%s1347_s8 + $0x38] sm:$0xff]   ;;  %v760_v16 = vld [vmem:[%s1459_s2] ss:$0 sm:$0xff]  ;;  %p1065_p6 = pnand %p1064_p4, %p1282_p10  ;;  %s1069_s24 = scalar_lea.vmem %s1068_s7, 2048 }
  0x60   : > { %867 = vmatpush3.bf16.msra.mxu0 %v990_v1  ;;  %905 = vmatpush3.bf16.msra.mxu1 %v990_v1  ;;  %v1371_v18 = vld [vmem:[%s1460_s3] ss:$0 sm:$0xff]  ;;  %p1070_p12 = scmp.lt.s32.totalorder %s1404_s28, %s1068_s7  ;;  %p1071_p11 = scmp.lt.s32.totalorder %s1069_s24, %s1063_s11 }
  0x61   : > { %868 = vmatprep.subr.bf16.mxu0 %v991_v2  ;;  %898 = vmatprep.subr.bf16.mxu1 %v991_v2  ;;  %p1066_p8 = pneg %p1065_p6 }
  0x62   : > { %p1072_p0 = por %p1071_p11, %p1070_p12 }
  0x64   : > { %869 = vmatpush3.bf16.msra.mxu0 %v991_v2  ;;  %906 = vmatpush3.bf16.msra.mxu1 %v991_v2  ;;  %p1073_p5 = pnand %p1072_p0, %p1066_p8 }
  0x65   : > { %870 = vmatprep.subr.bf16.mxu0 %v992_v3  ;;  %899 = vmatprep.subr.bf16.mxu1 %v992_v3 }
  0x68   : > { %871 = vmatpush3.bf16.msra.mxu0 %v992_v3  ;;  %907 = vmatpush3.bf16.msra.mxu1 %v992_v3 }
  0x69   : > { %872 = vmatprep.subr.bf16.mxu0 %v993_v6  ;;  %900 = vmatprep.subr.bf16.mxu1 %v993_v6 }
  0x6c   : > { %873 = vmatpush3.bf16.msra.mxu0 %v993_v6  ;;  %908 = vmatpush3.bf16.msra.mxu1 %v993_v6 }
  0x6d   : > { %874 = vmatprep.subr.bf16.mxu0 %v994_v7  ;;  %901 = vmatprep.subr.bf16.mxu1 %v994_v7 }
  0x70   : > { %875 = vmatpush3.bf16.msra.mxu0 %v994_v7  ;;  %909 = vmatpush3.bf16.msra.mxu1 %v994_v7 }
  0x71   : > { %876 = vmatprep.subr.bf16.mxu0 %v995_v8  ;;  %902 = vmatprep.subr.bf16.mxu1 %v995_v8 }
  0x74   : > { %877 = vmatpush3.bf16.msra.mxu0 %v995_v8  ;;  %910 = vmatpush3.bf16.msra.mxu1 %v995_v8 }
  0x75   : > { %878 = vmatprep.subr.bf16.mxu0 %v996_v9  ;;  %903 = vmatprep.subr.bf16.mxu1 %v996_v9 }
  0x78   : > { %879 = vmatpush3.bf16.msra.mxu0 %v996_v9  ;;  %911 = vmatpush3.bf16.msra.mxu1 %v996_v9 }
  0x7b   : > { %881 = vmatmul.mubr.bf16.vlgmr.msra.gmra.mrb[0].mxu0 %v999_v10  ;;  %889 = vmatmul.mubr.bf16.vlgmr.msra.gmra.mrb[0].mxu1 %v1000_v11 }
  0x7c   : > { %884 = vmatprep.mubr.bf16.mxu0 %v1001_v12  ;;  %892 = vmatprep.mubr.bf16.mxu1 %v1002_v13 }
  0x83   : > { %885 = vmatmul.mubr.bf16.gmra.mrb[4].mxu0 %v1003_v14  ;;  %893 = vmatmul.mubr.bf16.gmra.mrb[4].mxu1 %v1004_v15 }
 0x14e   : > { %v882_v17 = vpop.f32.mrb[0].mxu0  ;;  %v890_v19 = vpop.f32.mrb[0].mxu1 }
 0x14f   : > { %v486_v20 = vmul.f32 %v882_v17, %v760_v16  ;;  %v494_v21 = vmul.f32 %v890_v19, %v760_v16  ;;  %v414_v22 = vpop.f32.mrb[1].mxu0  ;;  %v446_v23 = vpop.f32.mrb[1].mxu1 }
 0x150   : > { %v484_v24 = vmul.f32 %v760_v16, %v414_v22  ;;  %v492_v25 = vmul.f32 %v760_v16, %v446_v23  ;;  %v883_v26 = vpop.f32.mrb[2].mxu0  ;;  %v891_v27 = vpop.f32.mrb[2].mxu1 }
 0x151   : > { %v509_v28 = vadd.f32 %v1371_v18, %v486_v20  ;;  %v517_v29 = vadd.f32 %v1371_v18, %v494_v21  ;;  %v487_v30 = vmul.f32 %v883_v26, %v760_v16  ;;  %v495_v31 = vmul.f32 %v891_v27, %v760_v16  ;;  %v417_v32 = vpop.f32.mrb[3].mxu0  ;;  %v449_v33 = vpop.f32.mrb[3].mxu1 }
 0x152   : > { %v507_v34 = vadd.f32 %v1371_v18, %v484_v24  ;;  %v515_v35 = vadd.f32 %v1371_v18, %v492_v25  ;;  %v485_v36 = vmul.f32 %v760_v16, %v417_v32  ;;  %v493_v37 = vmul.f32 %v760_v16, %v449_v33 }
 0x153   : > { %v510_v38 = vadd.f32 %v1371_v18, %v487_v30  ;;  %v518_v39 = vadd.f32 %v1371_v18, %v495_v31  ;;  %v525_v42 = vmax.f32 %v509_v28, 0.0  ;;  %v533_v43 = vmax.f32 %v517_v29, 0.0 }
 0x154   : > { %v508_v40 = vadd.f32 %v1371_v18, %v485_v36  ;;  %v516_v41 = vadd.f32 %v1371_v18, %v493_v37  ;;  %v523_v46 = vmax.f32 %v507_v34, 0.0  ;;  %v531_v47 = vmax.f32 %v515_v35, 0.0 }
 0x155   : > { %v526_v44 = vmax.f32 %v510_v38, 0.0  ;;  %v534_v45 = vmax.f32 %v518_v39, 0.0 }
 0x156   : > { %v524_v48 = vmax.f32 %v508_v40, 0.0  ;;  %v532_v49 = vmax.f32 %v516_v41, 0.0  ;;  %v886_v50 = vpop.f32.mrb[4].mxu0  ;;  %v894_v51 = vpop.f32.mrb[4].mxu1 }
 0x157   : > { %v809_v52 = vpack.c.bf16 %v526_v44, %v525_v42  ;;  %v829_v53 = vpack.c.bf16 %v534_v45, %v533_v43  ;;  %v490_v54 = vmul.f32 %v886_v50, %v760_v16  ;;  %v498_v55 = vmul.f32 %v894_v51, %v760_v16  ;;  %v430_v56 = vpop.f32.mrb[5].mxu0  ;;  %v462_v57 = vpop.f32.mrb[5].mxu1 }
 0x158   : > { %v804_v58 = vpack.c.bf16 %v524_v48, %v523_v46  ;;  %v824_v59 = vpack.c.bf16 %v532_v49, %v531_v47  ;;  %v488_v60 = vmul.f32 %v760_v16, %v430_v56  ;;  %v496_v61 = vmul.f32 %v760_v16, %v462_v57  ;;  %v887_v62 = vpop.f32.mrb[6].mxu0  ;;  %v895_v63 = vpop.f32.mrb[6].mxu1 }
 0x159   : > { %841 = vst [vmem:[%s1383_s21 + $0x8] sm:$0xff] %v809_v52   ;;  %845 = vst [vmem:[%s1383_s21 + $0x28] sm:$0xff] %v829_v53   ;;  %v513_v0 = vadd.f32 %v1371_v18, %v490_v54  ;;  %v521_v1 = vadd.f32 %v1371_v18, %v498_v55  ;;  %v491_v2 = vmul.f32 %v887_v62, %v760_v16  ;;  %v433_v4 = vpop.f32.mrb[7].mxu0  ;;  %v465_v5 = vpop.f32.mrb[7].mxu1 }
 0x15a   : > { %v499_v3 = vmul.f32 %v895_v63, %v760_v16  ;;  %805 = vst [vmem:[%s1383_s21] sm:$0xff] %v804_v58   ;;  %844 = vst [vmem:[%s1383_s21 + $0x20] sm:$0xff] %v824_v59   ;;  %v511_v6 = vadd.f32 %v1371_v18, %v488_v60  ;;  %v519_v7 = vadd.f32 %v1371_v18, %v496_v61 }
 0x15b   : > { %v489_v8 = vmul.f32 %v760_v16, %v433_v4  ;;  %v497_v9 = vmul.f32 %v760_v16, %v465_v5  ;;  %v514_v10 = vadd.f32 %v1371_v18, %v491_v2  ;;  %v529_v14 = vmax.f32 %v513_v0, 0.0 }
 0x15c   : > { %v522_v11 = vadd.f32 %v1371_v18, %v499_v3  ;;  %v537_v15 = vmax.f32 %v521_v1, 0.0  ;;  %v527_v16 = vmax.f32 %v511_v6, 0.0  ;;  %v535_v20 = vmax.f32 %v519_v7, 0.0 }
 0x15d   : > { %v512_v12 = vadd.f32 %v1371_v18, %v489_v8  ;;  %v520_v13 = vadd.f32 %v1371_v18, %v497_v9  ;;  %v530_v17 = vmax.f32 %v514_v10, 0.0 }
 0x15e   : > { %v538_v19 = vmax.f32 %v522_v11, 0.0 }
 0x15f   : > { %v528_v21 = vmax.f32 %v512_v12, 0.0  ;;  %v536_v22 = vmax.f32 %v520_v13, 0.0  ;;  %v819_v23 = vpack.c.bf16 %v530_v17, %v529_v14 }
 0x160   : > { %v839_v24 = vpack.c.bf16 %v538_v19, %v537_v15 }
 0x161   : > { %v814_v18 = vpack.c.bf16 %v528_v21, %v527_v16  ;;  %v834_v25 = vpack.c.bf16 %v536_v22, %v535_v20  ;;  %843 = vst [vmem:[%s1383_s21 + $0x18] sm:$0xff] %v819_v23  }
 0x162   : > { %847 = vst [vmem:[%s1383_s21 + $0x38] sm:$0xff] %v839_v24  }
 0x163   : > { %842 = vst [vmem:[%s1383_s21 + $0x10] sm:$0xff] %v814_v18   ;;  %846 = vst [vmem:[%s1383_s21 + $0x30] sm:$0xff] %v834_v25  }
 0x164   : > { %1076 = shalt.err (!%p1073_p5)
}
 0x165   : > { %s1077_s8 = scalar_lea.hbm %s1402_s18, 1024  ;;  %s1081_s27 = scalar_lea.hbm %s1461_s4, 2048 }
 0x166   : > { %p1078_p9 = scmp.ne.s32.totalorder %s1402_s18, %s1077_s8  ;;  %p1082_p3 = scmp.lt.u32.totalorder %s1402_s18, %s1461_s4 }
 0x167   : > { %p1083_p7 = scmp.lt.u32.totalorder %s1081_s27, %s1077_s8  ;;  %p1085_p4 = scmp.lt.u32.totalorder %s1077_s8, %s1402_s18 }
 0x168   : > { %p1079_p1 = pnand %p1078_p9, %p1282_p10 }
 0x169   : > { %p1084_p13 = por %p1083_p7, %p1082_p3 }
 0x16a   : > { %p1080_p2 = pneg %p1079_p1 }
 0x16b   : > { %p1086_p6 = por %p1085_p4, %p1084_p13 }
 0x16d   : > { %p1087_p8 = pnand %p1086_p6, %p1080_p2 }
 0x16f   : > { %1090 = shalt.err (!%p1087_p8)
}
 0x170   : > { %s1156_s22 = smov 64   ;;  %s1157_s6 = smov 4  }
 0x171   : > { %918 = dma.vmem_to_hbm [thread:$0]  (%p1282_p10), %s1404_s28, 1024, %s1402_s18, %s620_s9, %s1156_s22, %s1156_s22, %s1157_s6  }
 0x172 PF: > { %s650_s29 = sand.u32 1, %s1129_s15   ;;  %p1479_p12 = scmp.ne.s32.totalorder %s1469_s26, 0 }
 0x173   : > { %p1480_p11 = scmp.ge.s32.totalorder %s1149_s20, 2  ;;  %s651_s11 = scalar_lea.sflag [#allocation4], %s650_s29 }
 0x175   : > { %p929_p0 = pnand %p1480_p11, %p1479_p12 }
 0x177   : > { %1124 = dma.done.wait (!%p929_p0), %s651_s11, 1024  }
 0x178   : > { %1126 = vsyncadd (!%p929_p0), %s651_s11, 4294966272  ;;  %s21_s20 = sadd.s32 1, %s1149_s20   ;;  %s1481_s15 = smov %s1133_s16 }
 0x179   : > { %p18_p5 = scmp.ge.s32.totalorder %s21_s20, 4   ;;  %s1482_s16 = smov %s1137_s17 }
 0x17a   : > { %s1483_s17 = smov %s1291_s10  ;;  %s1484_s18 = smov %s1145_s19 }
 0x17b   : > { %s1485_s19 = smov %s1487_s5  ;;  %20 = sbr.rel (!%p18_p5) target bundleno = 7 (0x7), region = 85 }
 0x182   :  { %656 = vsyncpa [#allocation3], 1 }
 0x183   :  { %658 = vsyncpa [#allocation3 + $0x1], 1 }
 0x184   :  { %659 = vsyncpa [#allocation6], 1 }
 0x185   :  { %660 = vsyncpa [#allocation4], 1 }
 0x186   :  { %662 = vsyncpa [#allocation4 + $0x1], 1 }

</bundles_post_ra>
